<compile_context>
chip_gen: v6e
topology: v6e:2x2x1
jax: 0.10.0
libtpu: 0.0.40
codegen_flags: <defaults>
</compile_context>

<pallas_src>
import math

import jax
import jax.numpy as jnp
from jax.experimental import pallas as pl
from jax.experimental.pallas import tpu as pltpu


def _dotprod_attention_awe_kernel(enc_ref, wvs_ref, bias_ref, awe_ref, acc_ref):
    """Grid = (B_tiles, Pc_tiles); compressed-pixel axis is the trailing
    reduction axis.

    enc_ref  : (b_tile, p_tile, g*E)  lane-dense tile of reshaped encoder_out
    wvs_ref  : (g*E, E)               g-stacked Wv^T (folds the g lane groups)
    bias_ref : (1, E)                 P * bv (precomputed in f32)
    awe_ref  : (b_tile, E)            output (same block across the Pc axis)
    acc_ref  : (b_tile, g*E) f32 VMEM accumulator
    """
    pi = pl.program_id(1)

    @pl.when(pi == 0)
    def _():
        acc_ref[...] = jnp.zeros_like(acc_ref)

    # Reduce this pixel tile in f32: (b_tile, p_tile, g*E) -> (b_tile, g*E).
    acc_ref[...] += jnp.sum(enc_ref[...].astype(jnp.float32), axis=1)

    @pl.when(pi == pl.num_programs(1) - 1)
    def _():
        # awe = (sum_p enc) @ Wv^T + P * bv ; the g-stacked Wv^T folds the
        # g lane groups back into a single E-wide projection (K = g*E).
        awe_ref[...] = (
            jnp.dot(acc_ref[...], wvs_ref[...],
                    preferred_element_type=jnp.float32)
            + bias_ref[...]
        ).astype(awe_ref.dtype)


def _round_up(x, m):
    return ((x + m - 1) // m) * m


def _cdiv(a, b):
    return -(-a // b)


_TARGET_BLOCK_BYTES = 4 << 20          # ~4 MiB per enc buffer (x2 double-buffered)
_VMEM_LIMIT_BYTES = 32 * 1024 * 1024   # comfortable on v5e/v6e/v7x


def dotprod_attention(encoder_out, decoder_hidden, params):
    """Returns (attention_weighted_encoding, alphas), matching the module."""
    B, P, E = encoder_out.shape
    wk, bk, wv, bv, wq, bq = params
    # K/Q projections and decoder_hidden are provably dead under the
    # softmax(dim=1)-over-singleton semantics; only Wv / bv are needed.
    del decoder_hidden, wk, bk, wq, bq

    # ---- lane-dense regrouping: (B, P, E) -> (B, Pc, g*E), g*E -> 128 lanes.
    g = 128 // E if (E < 128 and 128 % E == 0) else 1
    lane = g * E

    itemsize = jnp.dtype(encoder_out.dtype).itemsize
    sub_align = 8 * max(1, 4 // max(1, itemsize))   # 8 f32, 16 bf16, 32 int8/fp8
    row_bytes = lane * itemsize

    Pc = _cdiv(P, g)

    # Pixel tile (compressed units): balanced tiles, multiple of sub_align,
    # capped so even the minimum batch tile (8) stays within the VMEM target.
    pc_cap = max(sub_align, _TARGET_BLOCK_BYTES // (8 * row_bytes))
    n_ptiles = max(1, _cdiv(Pc, pc_cap))
    p_tile = _round_up(_cdiv(Pc, n_ptiles), sub_align)
    Pc_pad = p_tile * n_ptiles

    # Batch tile: multiple of 8 (output-block sublane rule), bounded by the
    # VMEM target, and leaving >= 2 parallel blocks for megacore when B > 8.
    if B <= 8:
        b_tile = B
    else:
        cap_vmem = max(8, _TARGET_BLOCK_BYTES // (p_tile * row_bytes))
        cap_cores = max(8, B // 2)
        b_tile = max(8, (min(64, cap_vmem, cap_cores) // 8) * 8)
    B_pad = _round_up(B, b_tile)

    # Zero-pad (zeros contribute nothing to the pixel sum; bias uses real P).
    P_pad = Pc_pad * g
    if B_pad != B or P_pad != P:
        enc = jnp.pad(encoder_out, ((0, B_pad - B), (0, P_pad - P), (0, 0)))
    else:
        enc = encoder_out
    enc = enc.reshape(B_pad, Pc_pad, lane)   # free row-major reshape

    # g-stacked Wv^T (g*E, E) folds the lane groups inside the matmul; bias is
    # pre-scaled by the true pixel count.
    wvs = jnp.tile(wv.T.astype(jnp.float32), (g, 1))          # (g*E, E)
    bias = (jnp.float32(P) * bv.astype(jnp.float32)).reshape(1, E)

    grid = (B_pad // b_tile, Pc_pad // p_tile)

    awe = pl.pallas_call(
        _dotprod_attention_awe_kernel,
        grid=grid,
        in_specs=[
            pl.BlockSpec((b_tile, p_tile, lane), lambda bi, pi: (bi, pi, 0)),
            pl.BlockSpec((lane, E), lambda bi, pi: (0, 0)),
            pl.BlockSpec((1, E), lambda bi, pi: (0, 0)),
        ],
        # Output is tiny (B x E); masked stores here are negligible.
        out_specs=pl.BlockSpec((b_tile, E), lambda bi, pi: (bi, 0)),
        out_shape=jax.ShapeDtypeStruct((B_pad, E), jnp.float32),
        scratch_shapes=[pltpu.VMEM((b_tile, lane), jnp.float32)],
        compiler_params=pltpu.CompilerParams(
            dimension_semantics=("parallel", "arbitrary"),
            vmem_limit_bytes=_VMEM_LIMIT_BYTES),
    )(enc, wvs, bias)

    if B_pad != B:
        awe = awe[:B]

    # nn.Softmax(dim=1) over the singleton query axis is identically 1.0;
    # emit it from the wrapper (no kernel work, no (B,1,P) HBM writeback).
    alphas = jnp.ones((B, 1, P), dtype=jnp.float32)
    return awe, alphas


def _reference(encoder_out, decoder_hidden, params):
    """Full, un-simplified reproduction of the PyTorch forward."""
    wk, bk, wv, bv, wq, bq = params
    E = encoder_out.shape[-1]
    k = jnp.einsum('bpe,fe->bpf', encoder_out, wk) + bk
    v = jnp.einsum('bpe,fe->bpf', encoder_out, wv) + bv
    q = jnp.einsum('bd,ed->be', decoder_hidden, wq) + bq
    scores = jnp.einsum('be,bpe->bp', q, k) / math.sqrt(E)
    alphas = jax.nn.softmax(scores[:, None, :], axis=1)   # softmax over dim=1
    awe = jnp.einsum('bqp,bpe->bqe', alphas, v)[:, 0, :]
    return awe, alphas


if __name__ == "__main__":
    # Small shapes consistent with the module's forward.
    B, P = 2, 16            # batch, num_pixels
    encoder_dim = 32        # E
    decoder_dim = 48        # D
    # attention_dim is taken by __init__ but never used in forward.

    key = jax.random.PRNGKey(0)
    k_in, k_dec, k_wk, k_bk, k_wv, k_bv, k_wq, k_bq = jax.random.split(key, 8)

    encoder_out = jax.random.normal(k_in, (B, P, encoder_dim), dtype=jnp.float32)
    decoder_hidden = jax.random.normal(k_dec, (B, decoder_dim), dtype=jnp.float32)

    # PyTorch nn.Linear default init: U(-1/sqrt(fan_in), 1/sqrt(fan_in)).
    def uniform(k, shape, fan_in):
        bound = 1.0 / math.sqrt(fan_in)
        return jax.random.uniform(k, shape, jnp.float32, -bound, bound)

    wk = uniform(k_wk, (encoder_dim, encoder_dim), encoder_dim)
    bk = uniform(k_bk, (encoder_dim,), encoder_dim)
    wv = uniform(k_wv, (encoder_dim, encoder_dim), encoder_dim)
    bv = uniform(k_bv, (encoder_dim,), encoder_dim)
    wq = uniform(k_wq, (encoder_dim, decoder_dim), decoder_dim)
    bq = uniform(k_bq, (encoder_dim,), decoder_dim)
    params = (wk, bk, wv, bv, wq, bq)

    awe, alphas = dotprod_attention(encoder_out, decoder_hidden, params)
    jax.block_until_ready((awe, alphas))

    awe_ref, alphas_ref = _reference(encoder_out, decoder_hidden, params)
    assert awe.shape == (B, encoder_dim)
    assert alphas.shape == (B, 1, P)
    assert jnp.allclose(awe, awe_ref, atol=1e-4, rtol=1e-4)
    assert jnp.allclose(alphas, alphas_ref, atol=1e-5, rtol=1e-5)

    print("KERNEL_OK")
</pallas_src>

<mosaic_0001>
module attributes {stable_mosaic.version = 11 : i64} {
  func.func @_dotprod_attention_awe_kernel(%arg0: i32, %arg1: i32, %arg2: memref<2x8x128xf32, #tpu.memory_space<vmem>>, %arg3: memref<128x32xf32, #tpu.memory_space<vmem>>, %arg4: memref<1x32xf32, #tpu.memory_space<vmem>>, %arg5: memref<2x32xf32, #tpu.memory_space<vmem>>, %arg6: memref<2x128xf32, #tpu.memory_space<vmem>>) attributes {dimension_semantics = [#tpu.dimension_semantics<parallel>, #tpu.dimension_semantics<arbitrary>], iteration_bounds = array<i64: 1, 1>, scalar_prefetch = 0 : i64, scratch_operands = 1 : i64, tpu.core_type = #tpu.core_type<tc>, window_params = [{transform_indices = @transform_0, window_bounds = array<i64: 2, 8, 128>}, {pipeline_mode = #tpu.pipeline_mode<synchronous>, transform_indices = @transform_1, window_bounds = array<i64: 128, 32>}, {pipeline_mode = #tpu.pipeline_mode<synchronous>, transform_indices = @transform_2, window_bounds = array<i64: 1, 32>}, {transform_indices = @transform_3, window_bounds = array<i64: 2, 32>}]} {
    %c0_i32 = arith.constant 0 : i32
    %0 = arith.cmpi eq, %arg1, %c0_i32 : i32
    %1 = arith.extui %0 : i1 to i32
    %c0_i32_0 = arith.constant 0 : i32
    %2 = arith.cmpi ne, %1, %c0_i32_0 : i32
    scf.if %2 {
      %cst_9 = arith.constant 0.000000e+00 : f32
      %11 = vector.broadcast %cst_9 : f32 to vector<2x128xf32>
      %c0_10 = arith.constant 0 : index
      %c0_11 = arith.constant 0 : index
      %12 = vector.load %arg6[%c0_10, %c0_11] : memref<2x128xf32, #tpu.memory_space<vmem>>, vector<2x128xf32>
      tpu.vector_store %arg6[%c0_10, %c0_11], %11 {strides = array<i32>} : memref<2x128xf32, #tpu.memory_space<vmem>>, vector<2x128xf32>,
    } else {
    }
    %c0 = arith.constant 0 : index
    %c0_1 = arith.constant 0 : index
    %3 = vector.load %arg6[%c0, %c0_1] : memref<2x128xf32, #tpu.memory_space<vmem>>, vector<2x128xf32>
    %c0_2 = arith.constant 0 : index
    %c0_3 = arith.constant 0 : index
    %c0_4 = arith.constant 0 : index
    %4 = vector.load %arg2[%c0_2, %c0_3, %c0_4] : memref<2x8x128xf32, #tpu.memory_space<vmem>>, vector<2x8x128xf32>
    %cst = arith.constant dense<0.000000e+00> : vector<2x128xf32>
    %5 = vector.multi_reduction <add>, %4, %cst [1] : vector<2x8x128xf32> to vector<2x128xf32>
    %6 = arith.addf %3, %5 : vector<2x128xf32>
    %c0_5 = arith.constant 0 : index
    %c0_6 = arith.constant 0 : index
    %7 = vector.load %arg6[%c0_5, %c0_6] : memref<2x128xf32, #tpu.memory_space<vmem>>, vector<2x128xf32>
    tpu.vector_store %arg6[%c0_5, %c0_6], %6 {strides = array<i32>} : memref<2x128xf32, #tpu.memory_space<vmem>>, vector<2x128xf32>,
    %c0_i32_7 = arith.constant 0 : i32
    %8 = arith.cmpi eq, %arg1, %c0_i32_7 : i32
    %9 = arith.extui %8 : i1 to i32
    %c0_i32_8 = arith.constant 0 : i32
    %10 = arith.cmpi ne, %9, %c0_i32_8 : i32
    scf.if %10 {
      %c0_9 = arith.constant 0 : index
      %c0_10 = arith.constant 0 : index
      %11 = vector.load %arg6[%c0_9, %c0_10] : memref<2x128xf32, #tpu.memory_space<vmem>>, vector<2x128xf32>
      %c0_11 = arith.constant 0 : index
      %c0_12 = arith.constant 0 : index
      %12 = vector.load %arg3[%c0_11, %c0_12] : memref<128x32xf32, #tpu.memory_space<vmem>>, vector<128x32xf32>
      %cst_13 = arith.constant dense<0.000000e+00> : vector<2x32xf32>
      %13 = tpu.matmul %11, %12, %cst_13 {dimension_numbers = #tpu.dot_dimension_numbers<[1], [0], [0], [1], [0, 0, 1, 1], [], []>} : vector<2x128xf32>, vector<128x32xf32>, vector<2x32xf32> -> vector<2x32xf32>
      %c0_14 = arith.constant 0 : index
      %c0_15 = arith.constant 0 : index
      %14 = vector.load %arg4[%c0_14, %c0_15] : memref<1x32xf32, #tpu.memory_space<vmem>>, vector<1x32xf32>
      %15 = vector.broadcast %14 : vector<1x32xf32> to vector<2x32xf32>
      %16 = arith.addf %13, %15 : vector<2x32xf32>
      %c0_16 = arith.constant 0 : index
      %c0_17 = arith.constant 0 : index
      %17 = vector.load %arg5[%c0_16, %c0_17] : memref<2x32xf32, #tpu.memory_space<vmem>>, vector<2x32xf32>
      tpu.vector_store %arg5[%c0_16, %c0_17], %16 {strides = array<i32>} : memref<2x32xf32, #tpu.memory_space<vmem>>, vector<2x32xf32>,
    } else {
    }
    return
  }
  func.func @transform_0(%arg0: i32, %arg1: i32) -> (i32, i32, i32) {
    %c0_i32 = arith.constant 0 : i32
    %c0_i32_0 = arith.constant 0 : i32
    return %arg0, %arg1, %c0_i32 : i32, i32, i32
  }
  func.func @transform_1(%arg0: i32, %arg1: i32) -> (i32, i32) {
    %c0_i32 = arith.constant 0 : i32
    %c0_i32_0 = arith.constant 0 : i32
    %c0_i32_1 = arith.constant 0 : i32
    return %c0_i32, %c0_i32_0 : i32, i32
  }
  func.func @transform_2(%arg0: i32, %arg1: i32) -> (i32, i32) {
    %c0_i32 = arith.constant 0 : i32
    %c0_i32_0 = arith.constant 0 : i32
    %c0_i32_1 = arith.constant 0 : i32
    return %c0_i32, %c0_i32_0 : i32, i32
  }
  func.func @transform_3(%arg0: i32, %arg1: i32) -> (i32, i32) {
    %c0_i32 = arith.constant 0 : i32
    %c0_i32_0 = arith.constant 0 : i32
    return %arg0, %c0_i32 : i32, i32
  }
}

</mosaic_0001>

<bundles_post_ra>
// kernel: tpu_custom_call.1
= control target key start
LH: loop header
LB: loop body
LE: loop exit
PB: predicated region body
PF: predicated region fallthrough
CT: control target
= control target key end

     0   :  { %v233_v1 = vmov 0.0   ;;  %vm234_vm0 = vmmov 0   ;;  %s334_s0 = inlined_call_operand.vmem [shape: f32[2,8,128], index: 0, kind: input, shape index: {}]   ;;  %s335_s1 = inlined_call_operand.vmem [shape: f32[128,32], index: 1, kind: input, shape index: {}]   ;;  %s336_s2 = inlined_call_operand.vmem [shape: f32[1,32], index: 2, kind: input, shape index: {}]   ;;  %s337_s3 = inlined_call_operand.hbm [shape: f32[2,32], index: 3, kind: output, shape index: {}]  }
   0x1   :  { %v61_v0 = vld [vmem:[%s335_s1 + $0x78] sm:$0xff]  ;;  %173 = vmatprep.subr.mxu0 %v233_v1  ;;  %19 = vst [vmem:[#allocation2] sm:$0x3] %v233_v1  ;;  %v60_v2 = vld [vmem:[%s335_s1 + $0x70] sm:$0xff]  ;;  %205 = vmatprep.mubr.msk.f32.mxu0 %vm234_vm0, %v233_v1  ;;  %v59_v3 = vld [vmem:[%s335_s1 + $0x68] sm:$0xff] }
   0x2   :  { %174 = vmatpush3.msra.mxu0 %v61_v0  ;;  %v58_v4 = vld [vmem:[%s335_s1 + $0x60] sm:$0xff]  ;;  %v22_v6 = vld [vmem:[%s334_s0 + $0x8] sm:$0xff] }
   0x3   :  { %175 = vmatprep.subr.mxu0 %v233_v1  ;;  %v21_v5 = vld [vmem:[%s334_s0] sm:$0xff]  ;;  %v29_v8 = vrot.slane %v22_v6, 4 }
   0x4   :  { %176 = vmatpush3.msra.mxu0 %v60_v2  ;;  %v23_v7 = vrot.slane %v21_v5, 4 }
   0x5   :  { %177 = vmatprep.subr.mxu0 %v233_v1 }
   0x6   :  { %178 = vmatpush3.msra.mxu0 %v59_v3 }
   0x7   :  { %8 = vsyncpa [#allocation4], 0  ;;  %179 = vmatprep.subr.mxu0 %v233_v1  ;;  %v57_v9 = vld [vmem:[%s335_s1 + $0x58] sm:$0xff]  ;;  %v24_v10 = vadd.f32 %v23_v7, %v21_v5  ;;  %v30_v11 = vadd.f32 %v29_v8, %v22_v6  ;;  %v56_v12 = vld [vmem:[%s335_s1 + $0x50] sm:$0xff]  ;;  %vm37_vm1 = vcmask 1041409   ;;  %s235_s22 = smov [#allocation3]  }
   0x8   :  { %180 = vmatpush3.msra.mxu0 %v58_v4  ;;  %v55_v15 = vld [vmem:[%s335_s1 + $0x48] sm:$0xff]  ;;  %v54_v18 = vld [vmem:[%s335_s1 + $0x40] sm:$0xff]  ;;  %v53_v21 = vld [vmem:[%s335_s1 + $0x38] sm:$0xff]  ;;  %s147_s23 = sshll.u32 %s235_s22, 4  ;;  %vm139_vm2 = vcmask 254976   ;;  %s148_s23 = int_to_ptr.vmem [resolvable:$true] %s147_s23 }
   0x9   :  { %181 = vmatprep.subr.mxu0 %v233_v1  ;;  %v25_v13 = vrot.slane %v24_v10, 2  ;;  %v31_v14 = vrot.slane %v30_v11, 2  ;;  %v20_v22 = vld [vmem:[#allocation2] sm:$0x3]  ;;  %v52_v25 = vld [vmem:[%s335_s1 + $0x30] sm:$0xff]  ;;  %v51_v27 = vld [vmem:[%s335_s1 + $0x28] sm:$0xff]  ;;  %p216_p1 = scmp.lt.s32.totalorder %s148_s23, %s148_s23 }
   0xa   :  { %182 = vmatpush3.msra.mxu0 %v57_v9  ;;  %v50_v29 = vld [vmem:[%s335_s1 + $0x20] sm:$0xff]  ;;  %v49_v30 = vld [vmem:[%s335_s1 + $0x18] sm:$0xff]  ;;  %v48_v31 = vld [vmem:[%s335_s1 + $0x10] sm:$0xff]  ;;  %s211_s24 = scalar_lea.vmem %s148_s23, 32 }
   0xb   :  { %183 = vmatprep.subr.mxu0 %v233_v1  ;;  %v26_v16 = vadd.f32 %v25_v13, %v24_v10  ;;  %v32_v17 = vadd.f32 %v31_v14, %v30_v11  ;;  %v47_v32 = vld [vmem:[%s335_s1 + $0x8] sm:$0xff]  ;;  %v46_v33 = vld [vmem:[%s335_s1] sm:$0xff]  ;;  %p212_p0 = scmp.ne.s32.totalorder %s148_s23, %s211_s24  ;;  %p217_p2 = scmp.lt.s32.totalorder %s211_s24, %s211_s24 }
   0xc   :  { %184 = vmatpush3.msra.mxu0 %v56_v12  ;;  %v155_v35 = vld [vmem:[%s336_s2] ss:$0 sm:$0xff] }
   0xd   :  { %185 = vmatprep.subr.mxu0 %v233_v1  ;;  %v27_v19 = vrot.slane %v26_v16, 1  ;;  %v33_v20 = vrot.slane %v32_v17, 1  ;;  %p218_p3 = por %p217_p2, %p216_p1 }
   0xe   :  { %186 = vmatpush3.msra.mxu0 %v55_v15 }
   0xf   :  { %187 = vmatprep.subr.mxu0 %v233_v1  ;;  %v28_v23 = vadd.f32 %v27_v19, %v26_v16  ;;  %v34_v24 = vadd.f32 %v33_v20, %v32_v17  ;;  %p219_p4 = pnand %p218_p3, %p212_p0 }
  0x10   :  { %188 = vmatpush3.msra.mxu0 %v54_v18 }
  0x11   :  { %189 = vmatprep.subr.mxu0 %v233_v1  ;;  %v38_v26 = vsel %vm37_vm1, %v34_v24, %v28_v23 }
  0x12   :  { %190 = vmatpush3.msra.mxu0 %v53_v21  ;;  %v40_v28 = vadd.f32 %v38_v26, %v20_v22 }
  0x13   :  { %191 = vmatprep.subr.mxu0 %v233_v1 }
  0x14   :  { %192 = vmatpush3.msra.mxu0 %v52_v25  ;;  %41 = vst [vmem:[#allocation2] sm:$0x3] %v40_v28 }
  0x15   :  { %193 = vmatprep.subr.mxu0 %v233_v1 }
  0x16   :  { %194 = vmatpush3.msra.mxu0 %v51_v27 }
  0x17   :  { %195 = vmatprep.subr.mxu0 %v233_v1 }
  0x18   :  { %196 = vmatpush3.msra.mxu0 %v50_v29 }
  0x19   :  { %197 = vmatprep.subr.mxu0 %v233_v1 }
  0x1a   :  { %198 = vmatpush3.msra.mxu0 %v49_v30 }
  0x1b   :  { %199 = vmatprep.subr.mxu0 %v233_v1  ;;  %v45_v34 = vld [vmem:[#allocation2] sm:$0x3] }
  0x1c   :  { %200 = vmatpush3.msra.mxu0 %v48_v31 }
  0x1d   :  { %201 = vmatprep.subr.mxu0 %v233_v1 }
  0x1e   :  { %202 = vmatpush3.msra.mxu0 %v47_v32 }
  0x1f   :  { %203 = vmatprep.subr.mxu0 %v233_v1 }
  0x20   :  { %204 = vmatpush3.msra.mxu0 %v46_v33 }
  0x21   :  { %206 = vmatmul.mubr.f32.vlgmr.msra.gmra.mxu0 %v45_v34 }
  0xe1   :  { %v135_v36 = vpop.f32.mrf.mxu0 }
  0xe2   :  { %v136_v37 = vadd.f32 %v155_v35, %v135_v36 }
  0xe3   :  { %v207_v38 = vpop.f32.mrf.mxu0 }
  0xe4   :  { %140 = vst.msk [vmem:[#allocation3] sm:$0x3] %vm139_vm2, %v136_v37 }
  0xe5   :  { %222 = shalt.err (!%p219_p4)
}
  0xe6   :  { %150 = dma.vmem_to_hbm [thread:$0]  %s148_s23, 32, %s337_s3, [#allocation4]  }
  0xe7   :  { %231 = dma.done.wait [#allocation4], 32  }
  0xe8   :  { %232 = vsyncadd [#allocation4], 4294967264 }
  0xe9   :  { %154 = vsyncpa [#allocation4], 1 }

</bundles_post_ra>
